<compile_context>
chip_gen: v6e
topology: v6e:2x2x1
jax: 0.10.0
libtpu: 0.0.40
codegen_flags: <defaults>
</compile_context>

<pallas_src>
import jax
import jax.numpy as jnp
from jax import lax
from jax.experimental import pallas as pl
from jax.experimental.pallas import tpu as pltpu


def _round_up(x, m):
    return ((x + m - 1) // m) * m


def attention_matrix_kernel(x_ref, w_ref, o_ref):
    """x_ref: (TM, R) f32 tile of rows.
    w_ref: (R, S) f32, already L2-column-normalized.
    o_ref: (S, TM) f32 = sparsemax(x @ w, axis over S), stored transposed
           so the big M axis is lane-dense."""
    x = x_ref[...]                                   # (TM, R)
    w = w_ref[...]                                   # (R, S)

    # MXU: zT[s, m] = sum_r w[r, s] * x[m, r]  ->  (S, TM), M on the lane axis.
    zT = lax.dot_general(
        w, x,
        dimension_numbers=(((0,), (1,)), ((), ())),
        preferred_element_type=jnp.float32,
    )                                                # (S, TM)

    S = zT.shape[0]

    # Sort-free sparsemax over the slot (sublane) axis, lane-dense in M.
    #   k_j    = #{i : z_i >= z_j}
    #   ssum_j = sum_i z_i * [z_i >= z_j]
    #   valid_j: 1 + k_j * z_j > ssum_j
    #   k*     = max valid k,  tau = (S_{k*} - 1) / k*,  out = max(z - tau, 0)
    k_rows = []
    s_rows = []
    for j in range(S):                               # static unroll, S small
        zj = zT[j:j + 1, :]                          # (1, TM) sublane broadcast
        ge = (zT >= zj).astype(jnp.float32)          # (S, TM) lane-dense compare
        k_rows.append(jnp.sum(ge, axis=0, keepdims=True))        # (1, TM) XLU
        s_rows.append(jnp.sum(zT * ge, axis=0, keepdims=True))   # (1, TM) XLU
    k = jnp.concatenate(k_rows, axis=0)              # (S, TM)
    ssum = jnp.concatenate(s_rows, axis=0)           # (S, TM)

    valid = (1.0 + k * zT) > ssum                                        # (S, TM)
    k_star = jnp.max(jnp.where(valid, k, 0.0), axis=0, keepdims=True)    # (1, TM)
    pick = jnp.logical_and(valid, k == k_star)                           # (S, TM)
    inv_k = pl.reciprocal(k, approx=True)            # EUP slot, k >= 1 always
    tau_cand = jnp.where(pick, (ssum - 1.0) * inv_k, -jnp.inf)
    tau = jnp.max(tau_cand, axis=0, keepdims=True)                       # (1, TM)

    o_ref[...] = jnp.maximum(zT - tau, 0.0).astype(o_ref.dtype)


def attention_matrix_forward(refined_vec, attention_matrix, *, tm_max=1024):
    """refined_vec: (B, N, R); attention_matrix: (1, R, S) raw (un-normalized).
    Returns sparsemax(refined_vec @ normalize(attention_matrix)), shape (B, N, S)."""
    B, N, R = refined_vec.shape
    depth, R2, S = attention_matrix.shape
    assert depth == 1 and R2 == R

    # Glue: matches AttentionMatrix.normalize() — L2-normalize along refined_dim.
    # (PyTorch reference has no epsilon; torch.rand init makes zero columns impossible.)
    w = attention_matrix[0]
    w = (w / jnp.sqrt(jnp.sum(jnp.square(w), axis=0, keepdims=True))).astype(jnp.float32)

    M = B * N
    x2d = refined_vec.reshape(M, R).astype(jnp.float32)

    # Tile M; keep TM a multiple of 128 so the (S, TM) output block is lane-dense.
    TM = min(tm_max, _round_up(M, 128))
    M_pad = _round_up(M, TM)
    if M_pad != M:
        # Padded all-zero rows sparsemax to 1/S (no NaNs) and are sliced off below.
        x2d = jnp.pad(x2d, ((0, M_pad - M), (0, 0)))

    grid = (M_pad // TM,)

    cost = pl.CostEstimate(
        flops=int(2 * M_pad * R * S + 6 * M_pad * S * S),
        transcendentals=int(M_pad * S),
        bytes_accessed=int(4 * (M_pad * R + R * S + S * M_pad)),
    )

    outT = pl.pallas_call(
        attention_matrix_kernel,
        out_shape=jax.ShapeDtypeStruct((S, M_pad), jnp.float32),
        grid_spec=pltpu.PrefetchScalarGridSpec(
            num_scalar_prefetch=0,
            grid=grid,
            in_specs=[
                pl.BlockSpec((TM, R), lambda i: (i, 0)),   # rows tile
                pl.BlockSpec((R, S), lambda i: (0, 0)),    # weight, resident
            ],
            out_specs=pl.BlockSpec((S, TM), lambda i: (0, i)),
        ),
        compiler_params=pltpu.CompilerParams(
            dimension_semantics=("parallel",),             # shard M tiles across TCs
        ),
        cost_estimate=cost,
    )(x2d, w)

    out = outT.T[:M]                                       # (M, S)
    return out.reshape(B, N, S)


def _sparsemax_ref(z):
    """Pure-JAX reference sparsemax along the last axis (sorted formulation)."""
    S = z.shape[-1]
    z_sorted = jnp.flip(jnp.sort(z, axis=-1), axis=-1)
    ks = jnp.arange(1, S + 1, dtype=z.dtype)
    z_cum = jnp.cumsum(z_sorted, axis=-1)
    support = (1.0 + ks * z_sorted) > z_cum
    k_star = jnp.sum(support.astype(z.dtype), axis=-1, keepdims=True)
    idx = k_star.astype(jnp.int32) - 1
    tau = (jnp.take_along_axis(z_cum, idx, axis=-1) - 1.0) / k_star
    return jnp.maximum(z - tau, 0.0)


if __name__ == "__main__":
    # Small shapes consistent with the module: depth_dim=1, refined_dim=32, slot_dim=16.
    B, N, R, S = 2, 8, 32, 16
    key = jax.random.PRNGKey(0)
    k1, k2 = jax.random.split(key)

    # Deterministic "parameter" mimicking torch.rand(depth, refined, slot).
    attention_matrix = jax.random.uniform(k1, (1, R, S), dtype=jnp.float32)
    refined_vec = jax.random.normal(k2, (B, N, R), dtype=jnp.float32)

    out = attention_matrix_forward(refined_vec, attention_matrix)
    out = jax.block_until_ready(out)

    # Pure-JAX reference (same normalization + sparsemax).
    w_ref = attention_matrix[0]
    w_ref = w_ref / jnp.sqrt(jnp.sum(jnp.square(w_ref), axis=0, keepdims=True))
    ref = _sparsemax_ref(jnp.einsum("bnr,rs->bns", refined_vec, w_ref))

    assert out.shape == (B, N, S)
    assert bool(jnp.all(out >= -1e-6))
    assert bool(jnp.all(jnp.abs(jnp.sum(out, axis=-1) - 1.0) < 1e-2))
    assert bool(jnp.max(jnp.abs(out - ref)) < 1e-2)

    print("KERNEL_OK")
</pallas_src>

<mosaic_0001>
module attributes {stable_mosaic.version = 11 : i64} {
  func.func @attention_matrix_kernel(%arg0: i32, %arg1: memref<128x32xf32, #tpu.memory_space<vmem>>, %arg2: memref<32x16xf32, #tpu.memory_space<vmem>>, %arg3: memref<16x128xf32, #tpu.memory_space<vmem>>) attributes {dimension_semantics = [#tpu.dimension_semantics<parallel>], iteration_bounds = array<i64: 1>, scalar_prefetch = 0 : i64, scratch_operands = 0 : i64, tpu.core_type = #tpu.core_type<tc>, window_params = [{transform_indices = @transform_0, window_bounds = array<i64: 128, 32>}, {pipeline_mode = #tpu.pipeline_mode<synchronous>, transform_indices = @transform_1, window_bounds = array<i64: 32, 16>}, {transform_indices = @transform_2, window_bounds = array<i64: 16, 128>}]} {
    %c0 = arith.constant 0 : index
    %c0_0 = arith.constant 0 : index
    %0 = vector.load %arg1[%c0, %c0_0] : memref<128x32xf32, #tpu.memory_space<vmem>>, vector<128x32xf32>
    %c0_1 = arith.constant 0 : index
    %c0_2 = arith.constant 0 : index
    %1 = vector.load %arg2[%c0_1, %c0_2] : memref<32x16xf32, #tpu.memory_space<vmem>>, vector<32x16xf32>
    %cst = arith.constant dense<0.000000e+00> : vector<16x128xf32>
    %2 = tpu.matmul %1, %0, %cst {dimension_numbers = #tpu.dot_dimension_numbers<[0], [1], [1], [0], [0, 1, 1, 0], [], []>} : vector<32x16xf32>, vector<128x32xf32>, vector<16x128xf32> -> vector<16x128xf32>
    %3 = vector.extract_strided_slice %2 {offsets = [0, 0], sizes = [1, 128], strides = [1, 1]} : vector<16x128xf32> to vector<1x128xf32>
    %4 = vector.broadcast %3 : vector<1x128xf32> to vector<16x128xf32>
    %5 = arith.cmpf oge, %2, %4 : vector<16x128xf32>
    %6 = arith.extui %5 : vector<16x128xi1> to vector<16x128xi32>
    %7 = arith.sitofp %6 : vector<16x128xi32> to vector<16x128xf32>
    %cst_3 = arith.constant dense<0.000000e+00> : vector<128xf32>
    %8 = vector.multi_reduction <add>, %7, %cst_3 [0] : vector<16x128xf32> to vector<128xf32>
    %9 = vector.shape_cast %8 : vector<128xf32> to vector<1x128xf32>
    %10 = arith.mulf %2, %7 : vector<16x128xf32>
    %cst_4 = arith.constant dense<0.000000e+00> : vector<128xf32>
    %11 = vector.multi_reduction <add>, %10, %cst_4 [0] : vector<16x128xf32> to vector<128xf32>
    %12 = vector.shape_cast %11 : vector<128xf32> to vector<1x128xf32>
    %13 = vector.extract_strided_slice %2 {offsets = [1, 0], sizes = [1, 128], strides = [1, 1]} : vector<16x128xf32> to vector<1x128xf32>
    %14 = vector.broadcast %13 : vector<1x128xf32> to vector<16x128xf32>
    %15 = arith.cmpf oge, %2, %14 : vector<16x128xf32>
    %16 = arith.extui %15 : vector<16x128xi1> to vector<16x128xi32>
    %17 = arith.sitofp %16 : vector<16x128xi32> to vector<16x128xf32>
    %cst_5 = arith.constant dense<0.000000e+00> : vector<128xf32>
    %18 = vector.multi_reduction <add>, %17, %cst_5 [0] : vector<16x128xf32> to vector<128xf32>
    %19 = vector.shape_cast %18 : vector<128xf32> to vector<1x128xf32>
    %20 = arith.mulf %2, %17 : vector<16x128xf32>
    %cst_6 = arith.constant dense<0.000000e+00> : vector<128xf32>
    %21 = vector.multi_reduction <add>, %20, %cst_6 [0] : vector<16x128xf32> to vector<128xf32>
    %22 = vector.shape_cast %21 : vector<128xf32> to vector<1x128xf32>
    %23 = vector.extract_strided_slice %2 {offsets = [2, 0], sizes = [1, 128], strides = [1, 1]} : vector<16x128xf32> to vector<1x128xf32>
    %24 = vector.broadcast %23 : vector<1x128xf32> to vector<16x128xf32>
    %25 = arith.cmpf oge, %2, %24 : vector<16x128xf32>
    %26 = arith.extui %25 : vector<16x128xi1> to vector<16x128xi32>
    %27 = arith.sitofp %26 : vector<16x128xi32> to vector<16x128xf32>
    %cst_7 = arith.constant dense<0.000000e+00> : vector<128xf32>
    %28 = vector.multi_reduction <add>, %27, %cst_7 [0] : vector<16x128xf32> to vector<128xf32>
    %29 = vector.shape_cast %28 : vector<128xf32> to vector<1x128xf32>
    %30 = arith.mulf %2, %27 : vector<16x128xf32>
    %cst_8 = arith.constant dense<0.000000e+00> : vector<128xf32>
    %31 = vector.multi_reduction <add>, %30, %cst_8 [0] : vector<16x128xf32> to vector<128xf32>
    %32 = vector.shape_cast %31 : vector<128xf32> to vector<1x128xf32>
    %33 = vector.extract_strided_slice %2 {offsets = [3, 0], sizes = [1, 128], strides = [1, 1]} : vector<16x128xf32> to vector<1x128xf32>
    %34 = vector.broadcast %33 : vector<1x128xf32> to vector<16x128xf32>
    %35 = arith.cmpf oge, %2, %34 : vector<16x128xf32>
    %36 = arith.extui %35 : vector<16x128xi1> to vector<16x128xi32>
    %37 = arith.sitofp %36 : vector<16x128xi32> to vector<16x128xf32>
    %cst_9 = arith.constant dense<0.000000e+00> : vector<128xf32>
    %38 = vector.multi_reduction <add>, %37, %cst_9 [0] : vector<16x128xf32> to vector<128xf32>
    %39 = vector.shape_cast %38 : vector<128xf32> to vector<1x128xf32>
    %40 = arith.mulf %2, %37 : vector<16x128xf32>
    %cst_10 = arith.constant dense<0.000000e+00> : vector<128xf32>
    %41 = vector.multi_reduction <add>, %40, %cst_10 [0] : vector<16x128xf32> to vector<128xf32>
    %42 = vector.shape_cast %41 : vector<128xf32> to vector<1x128xf32>
    %43 = vector.extract_strided_slice %2 {offsets = [4, 0], sizes = [1, 128], strides = [1, 1]} : vector<16x128xf32> to vector<1x128xf32>
    %44 = vector.broadcast %43 : vector<1x128xf32> to vector<16x128xf32>
    %45 = arith.cmpf oge, %2, %44 : vector<16x128xf32>
    %46 = arith.extui %45 : vector<16x128xi1> to vector<16x128xi32>
    %47 = arith.sitofp %46 : vector<16x128xi32> to vector<16x128xf32>
    %cst_11 = arith.constant dense<0.000000e+00> : vector<128xf32>
    %48 = vector.multi_reduction <add>, %47, %cst_11 [0] : vector<16x128xf32> to vector<128xf32>
    %49 = vector.shape_cast %48 : vector<128xf32> to vector<1x128xf32>
    %50 = arith.mulf %2, %47 : vector<16x128xf32>
    %cst_12 = arith.constant dense<0.000000e+00> : vector<128xf32>
    %51 = vector.multi_reduction <add>, %50, %cst_12 [0] : vector<16x128xf32> to vector<128xf32>
    %52 = vector.shape_cast %51 : vector<128xf32> to vector<1x128xf32>
    %53 = vector.extract_strided_slice %2 {offsets = [5, 0], sizes = [1, 128], strides = [1, 1]} : vector<16x128xf32> to vector<1x128xf32>
    %54 = vector.broadcast %53 : vector<1x128xf32> to vector<16x128xf32>
    %55 = arith.cmpf oge, %2, %54 : vector<16x128xf32>
    %56 = arith.extui %55 : vector<16x128xi1> to vector<16x128xi32>
    %57 = arith.sitofp %56 : vector<16x128xi32> to vector<16x128xf32>
    %cst_13 = arith.constant dense<0.000000e+00> : vector<128xf32>
    %58 = vector.multi_reduction <add>, %57, %cst_13 [0] : vector<16x128xf32> to vector<128xf32>
    %59 = vector.shape_cast %58 : vector<128xf32> to vector<1x128xf32>
    %60 = arith.mulf %2, %57 : vector<16x128xf32>
    %cst_14 = arith.constant dense<0.000000e+00> : vector<128xf32>
    %61 = vector.multi_reduction <add>, %60, %cst_14 [0] : vector<16x128xf32> to vector<128xf32>
    %62 = vector.shape_cast %61 : vector<128xf32> to vector<1x128xf32>
    %63 = vector.extract_strided_slice %2 {offsets = [6, 0], sizes = [1, 128], strides = [1, 1]} : vector<16x128xf32> to vector<1x128xf32>
    %64 = vector.broadcast %63 : vector<1x128xf32> to vector<16x128xf32>
    %65 = arith.cmpf oge, %2, %64 : vector<16x128xf32>
    %66 = arith.extui %65 : vector<16x128xi1> to vector<16x128xi32>
    %67 = arith.sitofp %66 : vector<16x128xi32> to vector<16x128xf32>
    %cst_15 = arith.constant dense<0.000000e+00> : vector<128xf32>
    %68 = vector.multi_reduction <add>, %67, %cst_15 [0] : vector<16x128xf32> to vector<128xf32>
    %69 = vector.shape_cast %68 : vector<128xf32> to vector<1x128xf32>
    %70 = arith.mulf %2, %67 : vector<16x128xf32>
    %cst_16 = arith.constant dense<0.000000e+00> : vector<128xf32>
    %71 = vector.multi_reduction <add>, %70, %cst_16 [0] : vector<16x128xf32> to vector<128xf32>
    %72 = vector.shape_cast %71 : vector<128xf32> to vector<1x128xf32>
    %73 = vector.extract_strided_slice %2 {offsets = [7, 0], sizes = [1, 128], strides = [1, 1]} : vector<16x128xf32> to vector<1x128xf32>
    %74 = vector.broadcast %73 : vector<1x128xf32> to vector<16x128xf32>
    %75 = arith.cmpf oge, %2, %74 : vector<16x128xf32>
    %76 = arith.extui %75 : vector<16x128xi1> to vector<16x128xi32>
    %77 = arith.sitofp %76 : vector<16x128xi32> to vector<16x128xf32>
    %cst_17 = arith.constant dense<0.000000e+00> : vector<128xf32>
    %78 = vector.multi_reduction <add>, %77, %cst_17 [0] : vector<16x128xf32> to vector<128xf32>
    %79 = vector.shape_cast %78 : vector<128xf32> to vector<1x128xf32>
    %80 = arith.mulf %2, %77 : vector<16x128xf32>
    %cst_18 = arith.constant dense<0.000000e+00> : vector<128xf32>
    %81 = vector.multi_reduction <add>, %80, %cst_18 [0] : vector<16x128xf32> to vector<128xf32>
    %82 = vector.shape_cast %81 : vector<128xf32> to vector<1x128xf32>
    %83 = vector.extract_strided_slice %2 {offsets = [8, 0], sizes = [1, 128], strides = [1, 1]} : vector<16x128xf32> to vector<1x128xf32>
    %84 = vector.broadcast %83 : vector<1x128xf32> to vector<16x128xf32>
    %85 = arith.cmpf oge, %2, %84 : vector<16x128xf32>
    %86 = arith.extui %85 : vector<16x128xi1> to vector<16x128xi32>
    %87 = arith.sitofp %86 : vector<16x128xi32> to vector<16x128xf32>
    %cst_19 = arith.constant dense<0.000000e+00> : vector<128xf32>
    %88 = vector.multi_reduction <add>, %87, %cst_19 [0] : vector<16x128xf32> to vector<128xf32>
    %89 = vector.shape_cast %88 : vector<128xf32> to vector<1x128xf32>
    %90 = arith.mulf %2, %87 : vector<16x128xf32>
    %cst_20 = arith.constant dense<0.000000e+00> : vector<128xf32>
    %91 = vector.multi_reduction <add>, %90, %cst_20 [0] : vector<16x128xf32> to vector<128xf32>
    %92 = vector.shape_cast %91 : vector<128xf32> to vector<1x128xf32>
    %93 = vector.extract_strided_slice %2 {offsets = [9, 0], sizes = [1, 128], strides = [1, 1]} : vector<16x128xf32> to vector<1x128xf32>
    %94 = vector.broadcast %93 : vector<1x128xf32> to vector<16x128xf32>
    %95 = arith.cmpf oge, %2, %94 : vector<16x128xf32>
    %96 = arith.extui %95 : vector<16x128xi1> to vector<16x128xi32>
    %97 = arith.sitofp %96 : vector<16x128xi32> to vector<16x128xf32>
    %cst_21 = arith.constant dense<0.000000e+00> : vector<128xf32>
    %98 = vector.multi_reduction <add>, %97, %cst_21 [0] : vector<16x128xf32> to vector<128xf32>
    %99 = vector.shape_cast %98 : vector<128xf32> to vector<1x128xf32>
    %100 = arith.mulf %2, %97 : vector<16x128xf32>
    %cst_22 = arith.constant dense<0.000000e+00> : vector<128xf32>
    %101 = vector.multi_reduction <add>, %100, %cst_22 [0] : vector<16x128xf32> to vector<128xf32>
    %102 = vector.shape_cast %101 : vector<128xf32> to vector<1x128xf32>
    %103 = vector.extract_strided_slice %2 {offsets = [10, 0], sizes = [1, 128], strides = [1, 1]} : vector<16x128xf32> to vector<1x128xf32>
    %104 = vector.broadcast %103 : vector<1x128xf32> to vector<16x128xf32>
    %105 = arith.cmpf oge, %2, %104 : vector<16x128xf32>
    %106 = arith.extui %105 : vector<16x128xi1> to vector<16x128xi32>
    %107 = arith.sitofp %106 : vector<16x128xi32> to vector<16x128xf32>
    %cst_23 = arith.constant dense<0.000000e+00> : vector<128xf32>
    %108 = vector.multi_reduction <add>, %107, %cst_23 [0] : vector<16x128xf32> to vector<128xf32>
    %109 = vector.shape_cast %108 : vector<128xf32> to vector<1x128xf32>
    %110 = arith.mulf %2, %107 : vector<16x128xf32>
    %cst_24 = arith.constant dense<0.000000e+00> : vector<128xf32>
    %111 = vector.multi_reduction <add>, %110, %cst_24 [0] : vector<16x128xf32> to vector<128xf32>
    %112 = vector.shape_cast %111 : vector<128xf32> to vector<1x128xf32>
    %113 = vector.extract_strided_slice %2 {offsets = [11, 0], sizes = [1, 128], strides = [1, 1]} : vector<16x128xf32> to vector<1x128xf32>
    %114 = vector.broadcast %113 : vector<1x128xf32> to vector<16x128xf32>
    %115 = arith.cmpf oge, %2, %114 : vector<16x128xf32>
    %116 = arith.extui %115 : vector<16x128xi1> to vector<16x128xi32>
    %117 = arith.sitofp %116 : vector<16x128xi32> to vector<16x128xf32>
    %cst_25 = arith.constant dense<0.000000e+00> : vector<128xf32>
    %118 = vector.multi_reduction <add>, %117, %cst_25 [0] : vector<16x128xf32> to vector<128xf32>
    %119 = vector.shape_cast %118 : vector<128xf32> to vector<1x128xf32>
    %120 = arith.mulf %2, %117 : vector<16x128xf32>
    %cst_26 = arith.constant dense<0.000000e+00> : vector<128xf32>
    %121 = vector.multi_reduction <add>, %120, %cst_26 [0] : vector<16x128xf32> to vector<128xf32>
    %122 = vector.shape_cast %121 : vector<128xf32> to vector<1x128xf32>
    %123 = vector.extract_strided_slice %2 {offsets = [12, 0], sizes = [1, 128], strides = [1, 1]} : vector<16x128xf32> to vector<1x128xf32>
    %124 = vector.broadcast %123 : vector<1x128xf32> to vector<16x128xf32>
    %125 = arith.cmpf oge, %2, %124 : vector<16x128xf32>
    %126 = arith.extui %125 : vector<16x128xi1> to vector<16x128xi32>
    %127 = arith.sitofp %126 : vector<16x128xi32> to vector<16x128xf32>
    %cst_27 = arith.constant dense<0.000000e+00> : vector<128xf32>
    %128 = vector.multi_reduction <add>, %127, %cst_27 [0] : vector<16x128xf32> to vector<128xf32>
    %129 = vector.shape_cast %128 : vector<128xf32> to vector<1x128xf32>
    %130 = arith.mulf %2, %127 : vector<16x128xf32>
    %cst_28 = arith.constant dense<0.000000e+00> : vector<128xf32>
    %131 = vector.multi_reduction <add>, %130, %cst_28 [0] : vector<16x128xf32> to vector<128xf32>
    %132 = vector.shape_cast %131 : vector<128xf32> to vector<1x128xf32>
    %133 = vector.extract_strided_slice %2 {offsets = [13, 0], sizes = [1, 128], strides = [1, 1]} : vector<16x128xf32> to vector<1x128xf32>
    %134 = vector.broadcast %133 : vector<1x128xf32> to vector<16x128xf32>
    %135 = arith.cmpf oge, %2, %134 : vector<16x128xf32>
    %136 = arith.extui %135 : vector<16x128xi1> to vector<16x128xi32>
    %137 = arith.sitofp %136 : vector<16x128xi32> to vector<16x128xf32>
    %cst_29 = arith.constant dense<0.000000e+00> : vector<128xf32>
    %138 = vector.multi_reduction <add>, %137, %cst_29 [0] : vector<16x128xf32> to vector<128xf32>
    %139 = vector.shape_cast %138 : vector<128xf32> to vector<1x128xf32>
    %140 = arith.mulf %2, %137 : vector<16x128xf32>
    %cst_30 = arith.constant dense<0.000000e+00> : vector<128xf32>
    %141 = vector.multi_reduction <add>, %140, %cst_30 [0] : vector<16x128xf32> to vector<128xf32>
    %142 = vector.shape_cast %141 : vector<128xf32> to vector<1x128xf32>
    %143 = vector.extract_strided_slice %2 {offsets = [14, 0], sizes = [1, 128], strides = [1, 1]} : vector<16x128xf32> to vector<1x128xf32>
    %144 = vector.broadcast %143 : vector<1x128xf32> to vector<16x128xf32>
    %145 = arith.cmpf oge, %2, %144 : vector<16x128xf32>
    %146 = arith.extui %145 : vector<16x128xi1> to vector<16x128xi32>
    %147 = arith.sitofp %146 : vector<16x128xi32> to vector<16x128xf32>
    %cst_31 = arith.constant dense<0.000000e+00> : vector<128xf32>
    %148 = vector.multi_reduction <add>, %147, %cst_31 [0] : vector<16x128xf32> to vector<128xf32>
    %149 = vector.shape_cast %148 : vector<128xf32> to vector<1x128xf32>
    %150 = arith.mulf %2, %147 : vector<16x128xf32>
    %cst_32 = arith.constant dense<0.000000e+00> : vector<128xf32>
    %151 = vector.multi_reduction <add>, %150, %cst_32 [0] : vector<16x128xf32> to vector<128xf32>
    %152 = vector.shape_cast %151 : vector<128xf32> to vector<1x128xf32>
    %153 = vector.extract_strided_slice %2 {offsets = [15, 0], sizes = [1, 128], strides = [1, 1]} : vector<16x128xf32> to vector<1x128xf32>
    %154 = vector.broadcast %153 : vector<1x128xf32> to vector<16x128xf32>
    %155 = arith.cmpf oge, %2, %154 : vector<16x128xf32>
    %156 = arith.extui %155 : vector<16x128xi1> to vector<16x128xi32>
    %157 = arith.sitofp %156 : vector<16x128xi32> to vector<16x128xf32>
    %cst_33 = arith.constant dense<0.000000e+00> : vector<128xf32>
    %158 = vector.multi_reduction <add>, %157, %cst_33 [0] : vector<16x128xf32> to vector<128xf32>
    %159 = vector.shape_cast %158 : vector<128xf32> to vector<1x128xf32>
    %160 = arith.mulf %2, %157 : vector<16x128xf32>
    %cst_34 = arith.constant dense<0.000000e+00> : vector<128xf32>
    %161 = vector.multi_reduction <add>, %160, %cst_34 [0] : vector<16x128xf32> to vector<128xf32>
    %162 = vector.shape_cast %161 : vector<128xf32> to vector<1x128xf32>
    %163 = tpu.concatenate %9, %19, %29, %39, %49, %59, %69, %79, %89, %99, %109, %119, %129, %139, %149, %159 in 0 : vector<1x128xf32>, vector<1x128xf32>, vector<1x128xf32>, vector<1x128xf32>, vector<1x128xf32>, vector<1x128xf32>, vector<1x128xf32>, vector<1x128xf32>, vector<1x128xf32>, vector<1x128xf32>, vector<1x128xf32>, vector<1x128xf32>, vector<1x128xf32>, vector<1x128xf32>, vector<1x128xf32>, vector<1x128xf32> -> vector<16x128xf32>
    %164 = tpu.concatenate %12, %22, %32, %42, %52, %62, %72, %82, %92, %102, %112, %122, %132, %142, %152, %162 in 0 : vector<1x128xf32>, vector<1x128xf32>, vector<1x128xf32>, vector<1x128xf32>, vector<1x128xf32>, vector<1x128xf32>, vector<1x128xf32>, vector<1x128xf32>, vector<1x128xf32>, vector<1x128xf32>, vector<1x128xf32>, vector<1x128xf32>, vector<1x128xf32>, vector<1x128xf32>, vector<1x128xf32>, vector<1x128xf32> -> vector<16x128xf32>
    %165 = arith.mulf %163, %2 : vector<16x128xf32>
    %cst_35 = arith.constant 1.000000e+00 : f32
    %166 = vector.broadcast %cst_35 : f32 to vector<16x128xf32>
    %167 = arith.addf %166, %165 : vector<16x128xf32>
    %168 = arith.cmpf ogt, %167, %164 : vector<16x128xf32>
    %cst_36 = arith.constant 0.000000e+00 : f32
    %169 = vector.broadcast %cst_36 : f32 to vector<16x128xf32>
    %170 = arith.select %168, %163, %169 : vector<16x128xi1>, vector<16x128xf32>
    %cst_37 = arith.constant dense<0xFF800000> : vector<128xf32>
    %171 = vector.multi_reduction <maximumf>, %170, %cst_37 [0] : vector<16x128xf32> to vector<128xf32>
    %172 = vector.shape_cast %171 : vector<128xf32> to vector<1x128xf32>
    %173 = vector.broadcast %172 : vector<1x128xf32> to vector<16x128xf32>
    %174 = arith.cmpf oeq, %163, %173 : vector<16x128xf32>
    %175 = arith.andi %168, %174 : vector<16x128xi1>
    %176 = tpu.reciprocal %163 {approx = true} : vector<16x128xf32> -> vector<16x128xf32>
    %cst_38 = arith.constant 1.000000e+00 : f32
    %177 = vector.broadcast %cst_38 : f32 to vector<16x128xf32>
    %178 = arith.subf %164, %177 : vector<16x128xf32>
    %179 = arith.mulf %178, %176 : vector<16x128xf32>
    %cst_39 = arith.constant 0xFF800000 : f32
    %180 = vector.broadcast %cst_39 : f32 to vector<16x128xf32>
    %181 = arith.select %175, %179, %180 : vector<16x128xi1>, vector<16x128xf32>
    %cst_40 = arith.constant dense<0xFF800000> : vector<128xf32>
    %182 = vector.multi_reduction <maximumf>, %181, %cst_40 [0] : vector<16x128xf32> to vector<128xf32>
    %183 = vector.shape_cast %182 : vector<128xf32> to vector<1x128xf32>
    %184 = vector.broadcast %183 : vector<1x128xf32> to vector<16x128xf32>
    %185 = arith.subf %2, %184 : vector<16x128xf32>
    %cst_41 = arith.constant 0.000000e+00 : f32
    %186 = vector.broadcast %cst_41 : f32 to vector<16x128xf32>
    %187 = arith.maximumf %185, %186 : vector<16x128xf32>
    %c0_42 = arith.constant 0 : index
    %c0_43 = arith.constant 0 : index
    %188 = vector.load %arg3[%c0_42, %c0_43] : memref<16x128xf32, #tpu.memory_space<vmem>>, vector<16x128xf32>
    tpu.vector_store %arg3[%c0_42, %c0_43], %187 {strides = array<i32>} : memref<16x128xf32, #tpu.memory_space<vmem>>, vector<16x128xf32>,
    return
  }
  func.func @transform_0(%arg0: i32) -> (i32, i32) {
    %c0_i32 = arith.constant 0 : i32
    %c0_i32_0 = arith.constant 0 : i32
    return %arg0, %c0_i32 : i32, i32
  }
  func.func @transform_1(%arg0: i32) -> (i32, i32) {
    %c0_i32 = arith.constant 0 : i32
    %c0_i32_0 = arith.constant 0 : i32
    %c0_i32_1 = arith.constant 0 : i32
    return %c0_i32, %c0_i32_0 : i32, i32
  }
  func.func @transform_2(%arg0: i32) -> (i32, i32) {
    %c0_i32 = arith.constant 0 : i32
    %c0_i32_0 = arith.constant 0 : i32
    return %c0_i32, %arg0 : i32, i32
  }
}

</mosaic_0001>

<bundles_post_ra>
// kernel: tpu_custom_call.1
= control target key start
LH: loop header
LB: loop body
LE: loop exit
PB: predicated region body
PF: predicated region fallthrough
CT: control target
= control target key end

     0   :  { %vm64_vm0 = vcmask 261120   ;;  %s1232_s0 = inlined_call_operand.vmem [shape: f32[128,32], index: 0, kind: input, shape index: {}]   ;;  %s1233_s1 = inlined_call_operand.vmem [shape: f32[32,16], index: 1, kind: input, shape index: {}]   ;;  %s1234_s2 = inlined_call_operand.hbm [shape: f32[16,128], index: 2, kind: output, shape index: {}]  }
   0x1   :  { %v28_v0 = vld [vmem:[%s1233_s1] sm:$0xff]  ;;  %v27_v1 = vld [vmem:[%s1232_s0 + $0x78] sm:$0xff]  ;;  %v26_v2 = vld [vmem:[%s1232_s0 + $0x70] sm:$0xff] }
   0x2   :  { %32 = vxpose.xlu0.b32.start [1/4] (short) (narrow) %v28_v0, 16  ;;  %v29_v3 = vld [vmem:[%s1233_s1 + $0x8] sm:$0xff]  ;;  %771 = vmatprep.subr.msk.mxu0 %vm64_vm0, %v27_v1  ;;  %v30_v5 = vld [vmem:[%s1233_s1 + $0x10] sm:$0xff] }
   0x3   :  { %772 = vmatpush3.xpose.msk.msra.mxu0 %vm64_vm0, %v27_v1  ;;  %v25_v4 = vld [vmem:[%s1232_s0 + $0x68] sm:$0xff] }
   0x4   :  { %773 = vmatprep.subr.msk.mxu0 %vm64_vm0, %v26_v2 }
   0x6   :  { %33 = vxpose.xlu0.b32.cont [2/4] (short) (narrow) %v29_v3, 16 }
   0x7   :  { %7 = vsyncpa [#allocation3], 0  ;;  %774 = vmatpush3.xpose.msk.msra.mxu0 %vm64_vm0, %v26_v2  ;;  %v24_v6 = vld [vmem:[%s1232_s0 + $0x60] sm:$0xff]  ;;  %v31_v7 = vld [vmem:[%s1233_s1 + $0x18] sm:$0xff]  ;;  %v194_v22 = vlaneseq  ;;  %v836_v49 = vmov 0.0  }
   0x8   :  { %775 = vmatprep.subr.msk.mxu0 %vm64_vm0, %v25_v4  ;;  %v23_v8 = vld [vmem:[%s1232_s0 + $0x58] sm:$0xff]  ;;  %v22_v9 = vld [vmem:[%s1232_s0 + $0x50] sm:$0xff]  ;;  %v21_v10 = vld [vmem:[%s1232_s0 + $0x48] sm:$0xff] }
   0x9   :  { %v20_v11 = vld [vmem:[%s1232_s0 + $0x40] sm:$0xff]  ;;  %v19_v12 = vld [vmem:[%s1232_s0 + $0x38] sm:$0xff]  ;;  %v18_v13 = vld [vmem:[%s1232_s0 + $0x30] sm:$0xff]  ;;  %v949_v23 = vshrl.u32 %v194_v22, 7 }
   0xa   :  { %34 = vxpose.xlu0.b32.cont [3/4] (short) (narrow) %v30_v5, 16  ;;  %v17_v14 = vld [vmem:[%s1232_s0 + $0x28] sm:$0xff]  ;;  %v16_v15 = vld [vmem:[%s1232_s0 + $0x20] sm:$0xff]  ;;  %v15_v16 = vld [vmem:[%s1232_s0 + $0x18] sm:$0xff] }
   0xb   :  { %776 = vmatpush3.xpose.msk.msra.mxu0 %vm64_vm0, %v25_v4  ;;  %v14_v17 = vld [vmem:[%s1232_s0 + $0x10] sm:$0xff]  ;;  %v13_v18 = vld [vmem:[%s1232_s0 + $0x8] sm:$0xff]  ;;  %v12_v19 = vld [vmem:[%s1232_s0] sm:$0xff]  ;;  %v196_v24 = vsub.s32 0, %v949_v23  ;;  %v222_v25 = vsub.s32 1, %v949_v23  ;;  %v248_v26 = vsub.s32 2, %v949_v23 }
   0xc   :  { %777 = vmatprep.subr.msk.mxu0 %vm64_vm0, %v24_v6  ;;  %v274_v27 = vsub.s32 3, %v949_v23  ;;  %v300_v28 = vsub.s32 4, %v949_v23  ;;  %v326_v29 = vsub.s32 5, %v949_v23  ;;  %v352_v30 = vsub.s32 6, %v949_v23  ;;  %s837_s0 = smov [#allocation2]  }
   0xd   :  { %v378_v31 = vsub.s32 7, %v949_v23  ;;  %s690_s20 = sshll.u32 %s837_s0, 4  ;;  %s691_s20 = int_to_ptr.vmem [resolvable:$true] %s690_s20 }
   0xe   :  { %35 = vxpose.xlu0.b32.end [4/4] (short) (narrow) %v31_v7, 16  ;;  %s814_s21 = scalar_lea.vmem %s691_s20, 256  ;;  %p819_p1 = scmp.lt.s32.totalorder %s691_s20, %s691_s20 }
   0xf   :  { %778 = vmatpush3.xpose.msk.msra.mxu0 %vm64_vm0, %v24_v6  ;;  %p815_p0 = scmp.ne.s32.totalorder %s691_s20, %s814_s21  ;;  %p820_p2 = scmp.lt.s32.totalorder %s814_s21, %s814_s21 }
  0x10   :  { %779 = vmatprep.subr.msk.mxu0 %vm64_vm0, %v23_v8 }
  0x11   :  { %p821_p3 = por %p820_p2, %p819_p1 }
  0x13   :  { %780 = vmatpush3.xpose.msk.msra.mxu0 %vm64_vm0, %v23_v8  ;;  %p822_p4 = pnand %p821_p3, %p815_p0 }
  0x14   :  { %781 = vmatprep.subr.msk.mxu0 %vm64_vm0, %v22_v9 }
  0x17   :  { %782 = vmatpush3.xpose.msk.msra.mxu0 %vm64_vm0, %v22_v9 }
  0x18   :  { %783 = vmatprep.subr.msk.mxu0 %vm64_vm0, %v21_v10 }
  0x1b   :  { %784 = vmatpush3.xpose.msk.msra.mxu0 %vm64_vm0, %v21_v10 }
  0x1c   :  { %785 = vmatprep.subr.msk.mxu0 %vm64_vm0, %v20_v11 }
  0x1f   :  { %786 = vmatpush3.xpose.msk.msra.mxu0 %vm64_vm0, %v20_v11 }
  0x20   :  { %787 = vmatprep.subr.msk.mxu0 %vm64_vm0, %v19_v12 }
  0x23   :  { %788 = vmatpush3.xpose.msk.msra.mxu0 %vm64_vm0, %v19_v12 }
  0x24   :  { %789 = vmatprep.subr.msk.mxu0 %vm64_vm0, %v18_v13 }
  0x27   :  { %790 = vmatpush3.xpose.msk.msra.mxu0 %vm64_vm0, %v18_v13 }
  0x28   :  { %791 = vmatprep.subr.msk.mxu0 %vm64_vm0, %v17_v14 }
  0x2b   :  { %792 = vmatpush3.xpose.msk.msra.mxu0 %vm64_vm0, %v17_v14 }
  0x2c   :  { %793 = vmatprep.subr.msk.mxu0 %vm64_vm0, %v16_v15 }
  0x2f   :  { %794 = vmatpush3.xpose.msk.msra.mxu0 %vm64_vm0, %v16_v15 }
  0x30   :  { %795 = vmatprep.subr.msk.mxu0 %vm64_vm0, %v15_v16 }
  0x33   :  { %796 = vmatpush3.xpose.msk.msra.mxu0 %vm64_vm0, %v15_v16 }
  0x34   :  { %797 = vmatprep.subr.msk.mxu0 %vm64_vm0, %v14_v17 }
  0x37   :  { %798 = vmatpush3.xpose.msk.msra.mxu0 %vm64_vm0, %v14_v17 }
  0x38   :  { %799 = vmatprep.subr.msk.mxu0 %vm64_vm0, %v13_v18 }
  0x3b   :  { %800 = vmatpush3.xpose.msk.msra.mxu0 %vm64_vm0, %v13_v18 }
  0x3c   :  { %801 = vmatprep.subr.msk.mxu0 %vm64_vm0, %v12_v19 }
  0x3f   :  { %802 = vmatpush3.xpose.msk.msra.mxu0 %vm64_vm0, %v12_v19 }
  0x7e   :  { %v48_v20 = vpop.trf.xlu0 }
  0x7f   :  { %803 = vmatprep.mubr.msk.f32.mxu0 %vm64_vm0, %v48_v20 }
  0x82   :  { %v49_v21 = vpop.trf.xlu0 }
  0x83   :  { %804 = vmatmul.mubr.msk.f32.vlgmr.msra.gmra.mxu0 %vm64_vm0, %v49_v21 }
 0x143   :  { %v959_v32 = vpop.f32.mrf.mxu0 }
 0x144   :  { %v962_v33 = vrot.slane %v959_v32, %v196_v24  ;;  %v965_v34 = vrot.slane %v959_v32, %v222_v25  ;;  %v968_v35 = vrot.slane %v959_v32, %v248_v26  ;;  %v973_v37 = vrot.slane %v959_v32, %v274_v27 }
 0x145   :  { %v970_v36 = vpop.f32.mrf.mxu0  ;;  %v976_v38 = vrot.slane %v959_v32, %v300_v28  ;;  %v979_v39 = vrot.slane %v959_v32, %v326_v29  ;;  %v982_v40 = vrot.slane %v959_v32, %v352_v30  ;;  %v990_v44 = vrot.slane %v959_v32, %v378_v31 }
 0x146   :  { %v197_v41 = vrot.slane %v970_v36, %v196_v24  ;;  %v223_v42 = vrot.slane %v970_v36, %v222_v25  ;;  %v249_v43 = vrot.slane %v970_v36, %v248_v26  ;;  %v275_v45 = vrot.slane %v970_v36, %v274_v27 }
 0x147   :  { %v994_v46 = vrot.slane %v970_v36, %v300_v28  ;;  %v997_v47 = vrot.slane %v970_v36, %v326_v29  ;;  %v1000_v48 = vrot.slane %v970_v36, %v352_v30 }
 0x148   :  { %vm198_vm1 = vcmp.ge.f32.partialorder %v970_v36, %v197_v41  ;;  %vm199_vm2 = vcmp.ge.f32.partialorder %v959_v32, %v197_v41  ;;  %vm224_vm3 = vcmp.ge.f32.partialorder %v970_v36, %v223_v42  ;;  %vm225_vm4 = vcmp.ge.f32.partialorder %v959_v32, %v223_v42 }
 0x149   :  { %v719_v50 = vsel %vm198_vm1, 1.0, %v836_v49  ;;  %v720_v51 = vsel %vm199_vm2, 1.0, %v836_v49  ;;  %v721_v52 = vsel %vm224_vm3, 1.0, %v836_v49  ;;  %v722_v53 = vsel %vm225_vm4, 1.0, %v836_v49 }
 0x14a   :  { %v204_v54 = vadd.f32 %v720_v51, %v719_v50  ;;  %v211_v55 = vmul.f32 %v719_v50, %v970_v36  ;;  %v212_v56 = vmul.f32 %v959_v32, %v720_v51  ;;  %v230_v57 = vadd.f32 %v722_v53, %v721_v52 }
 0x14b   :  { %v237_v58 = vmul.f32 %v721_v52, %v970_v36  ;;  %v238_v59 = vmul.f32 %v959_v32, %v722_v53  ;;  %vm250_vm5 = vcmp.ge.f32.partialorder %v970_v36, %v249_v43  ;;  %vm251_vm6 = vcmp.ge.f32.partialorder %v959_v32, %v249_v43 }
 0x14c   :  { %v205_v60 = vrot.slane %v204_v54, 4  ;;  %v213_v61 = vadd.f32 %v212_v56, %v211_v55  ;;  %v231_v62 = vrot.slane %v230_v57, 4  ;;  %v723_v63 = vsel %vm250_vm5, 1.0, %v836_v49 }
 0x14d   :  { %v239_v0 = vadd.f32 %v238_v59, %v237_v58  ;;  %v724_v1 = vsel %vm251_vm6, 1.0, %v836_v49  ;;  %v263_v2 = vmul.f32 %v723_v63, %v970_v36  ;;  %vm276_vm7 = vcmp.ge.f32.partialorder %v970_v36, %v275_v45 }
 0x14e   :  { %v206_v3 = vadd.f32 %v205_v60, %v204_v54  ;;  %v214_v4 = vrot.slane %v213_v61, 4  ;;  %v232_v5 = vadd.f32 %v231_v62, %v230_v57  ;;  %v256_v6 = vadd.f32 %v724_v1, %v723_v63 }
 0x14f   :  { %v240_v7 = vrot.slane %v239_v0, 4  ;;  %v264_v8 = vmul.f32 %v959_v32, %v724_v1  ;;  %vm277_vm8 = vcmp.ge.f32.partialorder %v959_v32, %v275_v45  ;;  %v725_v9 = vsel %vm276_vm7, 1.0, %v836_v49 }
 0x150   :  { %v207_v10 = vrot.slane %v206_v3, 2  ;;  %v215_v11 = vadd.f32 %v214_v4, %v213_v61  ;;  %v233_v12 = vrot.slane %v232_v5, 2  ;;  %v257_v13 = vrot.slane %v256_v6, 4 }
 0x151   :  { %v241_v14 = vadd.f32 %v240_v7, %v239_v0  ;;  %v265_v15 = vadd.f32 %v264_v8, %v263_v2  ;;  %v726_v16 = vsel %vm277_vm8, 1.0, %v836_v49  ;;  %v289_v17 = vmul.f32 %v725_v9, %v970_v36 }
 0x152   :  { %v208_v18 = vadd.f32 %v207_v10, %v206_v3  ;;  %v216_v19 = vrot.slane %v215_v11, 2  ;;  %v234_v20 = vadd.f32 %v233_v12, %v232_v5  ;;  %v258_v21 = vadd.f32 %v257_v13, %v256_v6 }
 0x153   :  { %v242_v22 = vrot.slane %v241_v14, 2  ;;  %v266_v24 = vrot.slane %v265_v15, 4  ;;  %v282_v25 = vadd.f32 %v726_v16, %v725_v9  ;;  %v290_v26 = vmul.f32 %v959_v32, %v726_v16 }
 0x154   :  { %v209_v27 = vrot.slane %v208_v18, 1  ;;  %v217_v28 = vadd.f32 %v216_v19, %v215_v11  ;;  %v235_v29 = vrot.slane %v234_v20, 1  ;;  %v259_v30 = vrot.slane %v258_v21, 2 }
 0x155   :  { %v243_v41 = vadd.f32 %v242_v22, %v241_v14  ;;  %v267_v42 = vadd.f32 %v266_v24, %v265_v15  ;;  %v283_v43 = vrot.slane %v282_v25, 4  ;;  %v291_v45 = vadd.f32 %v290_v26, %v289_v17 }
 0x156   :  { %v1026_v50 = vadd.f32 %v209_v27, %v208_v18  ;;  %v218_v51 = vrot.slane %v217_v28, 1  ;;  %v260_v52 = vadd.f32 %v259_v30, %v258_v21  ;;  %v1031_v53 = vrot.slane %v970_v36, %v378_v31 }
 0x157   :  { %v244_v54 = vrot.slane %v243_v41, 1  ;;  %v268_v55 = vrot.slane %v267_v42, 2  ;;  %v284_v56 = vadd.f32 %v283_v43, %v282_v25  ;;  %v292_v57 = vrot.slane %v291_v45, 4 }
 0x158   :  { %v1033_v58 = vadd.f32 %v218_v51, %v217_v28  ;;  %v1035_v59 = vadd.f32 %v235_v29, %v234_v20  ;;  %vm302_vm9 = vcmp.ge.f32.partialorder %v970_v36, %v994_v46  ;;  %vm303_vm10 = vcmp.ge.f32.partialorder %v959_v32, %v994_v46 }
 0x159   :  { %v261_v60 = vrot.slane %v260_v52, 1  ;;  %v269_v61 = vadd.f32 %v268_v55, %v267_v42  ;;  %v285_v23 = vrot.slane %v284_v56, 2  ;;  %v293_v62 = vadd.f32 %v292_v57, %v291_v45 }
 0x15a   :  { %v1041_v31 = vadd.f32 %v244_v54, %v243_v41  ;;  %v727_v63 = vsel %vm302_vm9, 1.0, %v836_v49  ;;  %v728_v0 = vsel %vm303_vm10, 1.0, %v836_v49  ;;  %vm328_vm11 = vcmp.ge.f32.partialorder %v970_v36, %v997_v47 }
 0x15b   :  { %v270_v1 = vrot.slane %v269_v61, 1  ;;  %v286_v2 = vadd.f32 %v285_v23, %v284_v56  ;;  %v294_v3 = vrot.slane %v293_v62, 2  ;;  %v308_v4 = vadd.f32 %v728_v0, %v727_v63 }
 0x15c   :  { %v315_v5 = vmul.f32 %v727_v63, %v970_v36  ;;  %v316_v46 = vmul.f32 %v959_v32, %v728_v0  ;;  %vm329_vm12 = vcmp.ge.f32.partialorder %v959_v32, %v997_v47  ;;  %v729_v6 = vsel %vm328_vm11, 1.0, %v836_v49 }
 0x15d   :  { %v1052_v7 = vadd.f32 %v261_v60, %v260_v52  ;;  %v287_v8 = vrot.slane %v286_v2, 1  ;;  %v295_v9 = vadd.f32 %v294_v3, %v293_v62  ;;  %v309_v10 = vrot.slane %v308_v4, 4 }
 0x15e   :  { %v317_v11 = vadd.f32 %v316_v46, %v315_v5  ;;  %v730_v12 = vsel %vm329_vm12, 1.0, %v836_v49  ;;  %v341_v13 = vmul.f32 %v729_v6, %v970_v36  ;;  %vm354_vm13 = vcmp.ge.f32.partialorder %v970_v36, %v1000_v48 }
 0x15f   :  { %v1058_v14 = vadd.f32 %v270_v1, %v269_v61  ;;  %v1060_v15 = vadd.f32 %v287_v8, %v286_v2  ;;  %v310_v47 = vadd.f32 %v309_v10, %v308_v4  ;;  %v334_v16 = vadd.f32 %v730_v12, %v729_v6 }
 0x160   :  { %v318_v17 = vrot.slane %v317_v11, 4  ;;  %v342_v18 = vmul.f32 %v959_v32, %v730_v12  ;;  %vm355_vm14 = vcmp.ge.f32.partialorder %v959_v32, %v1000_v48  ;;  %v731_v19 = vsel %vm354_vm13, 1.0, %v836_v49 }
 0x161   :  { %v296_v20 = vrot.slane %v295_v9, 1  ;;  %v311_v21 = vrot.slane %v310_v47, 2  ;;  %v335_v22 = vrot.slane %v334_v16, 4  ;;  %v732_v24 = vsel %vm355_vm14, 1.0, %v836_v49 }
 0x162   :  { %v319_v25 = vadd.f32 %v318_v17, %v317_v11  ;;  %v343_v26 = vadd.f32 %v342_v18, %v341_v13  ;;  %v360_v27 = vadd.f32 %v732_v24, %v731_v19  ;;  %v367_v28 = vmul.f32 %v731_v19, %v970_v36 }
 0x163   :  { %v312_v29 = vadd.f32 %v311_v21, %v310_v47  ;;  %v336_v30 = vadd.f32 %v335_v22, %v334_v16  ;;  %v368_v41 = vmul.f32 %v959_v32, %v732_v24  ;;  %vm380_vm15 = vcmp.ge.f32.partialorder %v970_v36, %v1031_v53 }
 0x164   :  { %v320_v48 = vrot.slane %v319_v25, 2  ;;  %v344_v42 = vrot.slane %v343_v26, 4  ;;  %v361_v43 = vrot.slane %v360_v27, 4  ;;  %vm381_vm0 = vcmp.ge.f32.partialorder %v959_v32, %v1031_v53 }
 0x165   :  { %v313_v45 = vrot.slane %v312_v29, 1  ;;  %v337_v51 = vrot.slane %v336_v30, 2  ;;  %v369_v52 = vadd.f32 %v368_v41, %v367_v28  ;;  %v733_v54 = vsel %vm380_vm15, 1.0, %v836_v49 }
 0x166   :  { %v321_v55 = vadd.f32 %v320_v48, %v319_v25  ;;  %v345_v56 = vadd.f32 %v344_v42, %v343_v26  ;;  %v362_v57 = vadd.f32 %v361_v43, %v360_v27  ;;  %v734_v60 = vsel %vm381_vm0, 1.0, %v836_v49 }
 0x167   :  { %v1075_v61 = vadd.f32 %v296_v20, %v295_v9  ;;  %v338_v23 = vadd.f32 %v337_v51, %v336_v30  ;;  %v370_v62 = vrot.slane %v369_v52, 4  ;;  %v386_v63 = vadd.f32 %v734_v60, %v733_v54 }
 0x168   :  { %v322_v0 = vrot.slane %v321_v55, 1  ;;  %v346_v1 = vrot.slane %v345_v56, 2  ;;  %v363_v2 = vrot.slane %v362_v57, 2  ;;  %v393_v53 = vmul.f32 %v733_v54, %v970_v36 }
 0x169   :  { %v1078_v3 = vadd.f32 %v313_v45, %v312_v29  ;;  %v371_v4 = vadd.f32 %v370_v62, %v369_v52  ;;  %v387_v5 = vrot.slane %v386_v63, 4  ;;  %v394_v46 = vmul.f32 %v959_v32, %v734_v60 }
 0x16a   :  { %v339_v6 = vrot.slane %v338_v23, 1  ;;  %v347_v8 = vadd.f32 %v346_v1, %v345_v56  ;;  %v364_v10 = vadd.f32 %v363_v2, %v362_v57  ;;  %vm406_vm1 = vcmp.ge.f32.partialorder %v970_v36, %v962_v33 }
 0x16b   :  { %v1083_v9 = vadd.f32 %v322_v0, %v321_v55  ;;  %v372_v11 = vrot.slane %v371_v4, 2  ;;  %v388_v12 = vadd.f32 %v387_v5, %v386_v63  ;;  %v395_v13 = vadd.f32 %v394_v46, %v393_v53 }
 0x16c   :  { %v348_v47 = vrot.slane %v347_v8, 1  ;;  %v365_v16 = vrot.slane %v364_v10, 1  ;;  %vm407_vm2 = vcmp.ge.f32.partialorder %v959_v32, %v962_v33  ;;  %v735_v17 = vsel %vm406_vm1, 1.0, %v836_v49 }
 0x16d   :  { %v373_v18 = vadd.f32 %v372_v11, %v371_v4  ;;  %v389_v19 = vrot.slane %v388_v12, 2  ;;  %v396_v20 = vrot.slane %v395_v13, 4  ;;  %v736_v21 = vsel %vm407_vm2, 1.0, %v836_v49 }
 0x16e   :  { %v1089_v22 = vadd.f32 %v339_v6, %v338_v23  ;;  %v1091_v24 = vadd.f32 %v348_v47, %v347_v8  ;;  %v412_v25 = vadd.f32 %v736_v21, %v735_v17  ;;  %v419_v26 = vmul.f32 %v735_v17, %v970_v36 }
 0x16f   :  { %v374_v27 = vrot.slane %v373_v18, 1  ;;  %v390_v28 = vadd.f32 %v389_v19, %v388_v12  ;;  %v397_v29 = vadd.f32 %v396_v20, %v395_v13  ;;  %v420_v30 = vmul.f32 %v959_v32, %v736_v21 }
 0x170   :  { %v1095_v33 = vadd.f32 %v365_v16, %v364_v10  ;;  %v413_v41 = vrot.slane %v412_v25, 4  ;;  %vm432_vm3 = vcmp.ge.f32.partialorder %v970_v36, %v965_v34  ;;  %vm433_vm4 = vcmp.ge.f32.partialorder %v959_v32, %v965_v34 }
 0x171   :  { %v1101_v48 = vadd.f32 %v374_v27, %v373_v18  ;;  %v398_v42 = vrot.slane %v397_v29, 2  ;;  %v421_v43 = vadd.f32 %v420_v30, %v419_v26  ;;  %vm458_vm5 = vcmp.ge.f32.partialorder %v970_v36, %v968_v35 }
 0x172   :  { %v414_v45 = vadd.f32 %v413_v41, %v412_v25  ;;  %v737_v51 = vsel %vm432_vm3, 1.0, %v836_v49  ;;  %v738_v52 = vsel %vm433_vm4, 1.0, %v836_v49  ;;  %vm459_vm6 = vcmp.ge.f32.partialorder %v959_v32, %v968_v35 }
 0x173   :  { %v391_v54 = vrot.slane %v390_v28, 1  ;;  %v399_v55 = vadd.f32 %v398_v42, %v397_v29  ;;  %v422_v56 = vrot.slane %v421_v43, 4  ;;  %v438_v57 = vadd.f32 %v738_v52, %v737_v51 }
 0x174   :  { %v415_v34 = vrot.slane %v414_v45, 2  ;;  %v445_v60 = vmul.f32 %v737_v51, %v970_v36  ;;  %v446_v23 = vmul.f32 %v959_v32, %v738_v52  ;;  %v739_v62 = vsel %vm458_vm5, 1.0, %v836_v49 }
 0x175   :  { %v400_v63 = vrot.slane %v399_v55, 1  ;;  %v423_v0 = vadd.f32 %v422_v56, %v421_v43  ;;  %v439_v1 = vrot.slane %v438_v57, 4  ;;  %v740_v2 = vsel %vm459_vm6, 1.0, %v836_v49 }
 0x176   :  { %v416_v53 = vadd.f32 %v415_v34, %v414_v45  ;;  %v447_v4 = vadd.f32 %v446_v23, %v445_v60  ;;  %v464_v5 = vadd.f32 %v740_v2, %v739_v62  ;;  %v471_v35 = vmul.f32 %v739_v62, %v970_v36 }
 0x177   :  { %v1114_v46 = vadd.f32 %v391_v54, %v390_v28  ;;  %v424_v6 = vrot.slane %v423_v0, 2  ;;  %v440_v8 = vadd.f32 %v439_v1, %v438_v57  ;;  %v472_v10 = vmul.f32 %v959_v32, %v740_v2 }
 0x178   :  { %v417_v11 = vrot.slane %v416_v53, 1  ;;  %v448_v12 = vrot.slane %v447_v4, 4  ;;  %v465_v13 = vrot.slane %v464_v5, 4  ;;  %vm484_vm7 = vcmp.ge.f32.partialorder %v970_v36, %v973_v37 }
 0x179   :  { %v425_v47 = vadd.f32 %v424_v6, %v423_v0  ;;  %v441_v16 = vrot.slane %v440_v8, 2  ;;  %v473_v17 = vadd.f32 %v472_v10, %v471_v35  ;;  %vm485_vm8 = vcmp.ge.f32.partialorder %v959_v32, %v973_v37 }
 0x17a   :  { %v1121_v18 = vadd.f32 %v400_v63, %v399_v55  ;;  %v449_v19 = vadd.f32 %v448_v12, %v447_v4  ;;  %v466_v20 = vadd.f32 %v465_v13, %v464_v5  ;;  %v741_v21 = vsel %vm484_vm7, 1.0, %v836_v49 }
 0x17b   :  { %v426_v25 = vrot.slane %v425_v47, 1  ;;  %v442_v26 = vadd.f32 %v441_v16, %v440_v8  ;;  %v474_v27 = vrot.slane %v473_v17, 4  ;;  %v742_v28 = vsel %vm485_vm8, 1.0, %v836_v49 }
 0x17c   :  { %v450_v29 = vrot.slane %v449_v19, 2  ;;  %v467_v30 = vrot.slane %v466_v20, 2  ;;  %v490_v41 = vadd.f32 %v742_v28, %v741_v21  ;;  %v497_v42 = vmul.f32 %v741_v21, %v970_v36 }
 0x17d   :  { %v1126_v43 = vadd.f32 %v417_v11, %v416_v53  ;;  %v443_v45 = vrot.slane %v442_v26, 1  ;;  %v475_v37 = vadd.f32 %v474_v27, %v473_v17  ;;  %v498_v51 = vmul.f32 %v959_v32, %v742_v28 }
 0x17e   :  { %v451_v52 = vadd.f32 %v450_v29, %v449_v19  ;;  %v468_v54 = vadd.f32 %v467_v30, %v466_v20  ;;  %v491_v55 = vrot.slane %v490_v41, 4  ;;  %vm510_vm9 = vcmp.ge.f32.partialorder %v970_v36, %v976_v38 }
 0x17f   :  { %v1131_v56 = vadd.f32 %v426_v25, %v425_v47  ;;  %v476_v57 = vrot.slane %v475_v37, 2  ;;  %v499_v34 = vadd.f32 %v498_v51, %v497_v42  ;;  %vm511_vm10 = vcmp.ge.f32.partialorder %v959_v32, %v976_v38 }
 0x180   :  { %v452_v60 = vrot.slane %v451_v52, 1  ;;  %v469_v23 = vrot.slane %v468_v54, 1  ;;  %v492_v62 = vadd.f32 %v491_v55, %v490_v41  ;;  %v743_v63 = vsel %vm510_vm9, 1.0, %v836_v49 }
 0x181   :  { %v477_v0 = vadd.f32 %v476_v57, %v475_v37  ;;  %v500_v1 = vrot.slane %v499_v34, 4  ;;  %v744_v2 = vsel %vm511_vm10, 1.0, %v836_v49  ;;  %v523_v53 = vmul.f32 %v743_v63, %v970_v36 }
 0x182   :  { %v1138_v4 = vadd.f32 %v443_v45, %v442_v26  ;;  %v1140_v5 = vadd.f32 %v452_v60, %v451_v52  ;;  %v493_v35 = vrot.slane %v492_v62, 2  ;;  %v516_v6 = vadd.f32 %v744_v2, %v743_v63 }
 0x183   :  { %v478_v8 = vrot.slane %v477_v0, 1  ;;  %v501_v10 = vadd.f32 %v500_v1, %v499_v34  ;;  %v524_v38 = vmul.f32 %v959_v32, %v744_v2  ;;  %vm536_vm11 = vcmp.ge.f32.partialorder %v970_v36, %v979_v39 }
 0x184   :  { %v494_v11 = vadd.f32 %v493_v35, %v492_v62  ;;  %v517_v12 = vrot.slane %v516_v6, 4  ;;  %vm537_vm12 = vcmp.ge.f32.partialorder %v959_v32, %v979_v39  ;;  %v745_v13 = vsel %vm536_vm11, 1.0, %v836_v49 }
 0x185   :  { %v1148_v47 = vadd.f32 %v469_v23, %v468_v54  ;;  %v502_v16 = vrot.slane %v501_v10, 2  ;;  %v525_v17 = vadd.f32 %v524_v38, %v523_v53  ;;  %v746_v19 = vsel %vm537_vm12, 1.0, %v836_v49 }
 0x186   :  { %v495_v20 = vrot.slane %v494_v11, 1  ;;  %v518_v21 = vadd.f32 %v517_v12, %v516_v6  ;;  %v542_v25 = vadd.f32 %v746_v19, %v745_v13  ;;  %v549_v26 = vmul.f32 %v745_v13, %v970_v36 }
 0x187   :  { %v503_v27 = vadd.f32 %v502_v16, %v501_v10  ;;  %v526_v28 = vrot.slane %v525_v17, 4  ;;  %v550_v29 = vmul.f32 %v959_v32, %v746_v19  ;;  %vm562_vm13 = vcmp.ge.f32.partialorder %v970_v36, %v982_v40 }
 0x188   :  { %v1155_v39 = vadd.f32 %v478_v8, %v477_v0  ;;  %v519_v30 = vrot.slane %v518_v21, 2  ;;  %v543_v41 = vrot.slane %v542_v25, 4  ;;  %vm563_vm14 = vcmp.ge.f32.partialorder %v959_v32, %v982_v40 }
 0x189   :  { %v504_v42 = vrot.slane %v503_v27, 1  ;;  %v527_v45 = vadd.f32 %v526_v28, %v525_v17  ;;  %v551_v37 = vadd.f32 %v550_v29, %v549_v26  ;;  %v747_v51 = vsel %vm562_vm13, 1.0, %v836_v49 }
 0x18a   :  { %vm610_vm15 = vcmask 1040384   ;;  %v520_v52 = vadd.f32 %v519_v30, %v518_v21  ;;  %v544_v54 = vadd.f32 %v543_v41, %v542_v25  ;;  %v748_v55 = vsel %vm563_vm14, 1.0, %v836_v49 }
 0x18b   :  { %v575_v57 = vmul.f32 %v747_v51, %v970_v36  ;;  %vm612_vm0 = vcmask 1041408   ;;  %v496_v34 = vadd.f32 %v495_v20, %v494_v11  ;;  %v528_v60 = vrot.slane %v527_v45, 2 }
 0x18c   :  { %v552_v23 = vrot.slane %v551_v37, 4  ;;  %v568_v62 = vadd.f32 %v748_v55, %v747_v51  ;;  %vm614_vm1 = vcmask 1042432   ;;  %v521_v63 = vrot.slane %v520_v52, 1 }
 0x18d   :  { %v545_v40 = vrot.slane %v544_v54, 2  ;;  %v576_v0 = vmul.f32 %v959_v32, %v748_v55  ;;  %vm588_vm2 = vcmp.ge.f32.partialorder %v970_v36, %v990_v44  ;;  %vm616_vm3 = vcmask 1043456  }
 0x18e   :  { %v529_v1 = vadd.f32 %v528_v60, %v527_v45  ;;  %v553_v2 = vadd.f32 %v552_v23, %v551_v37  ;;  %v569_v53 = vrot.slane %v568_v62, 4  ;;  %vm589_vm4 = vcmp.ge.f32.partialorder %v959_v32, %v990_v44 }
 0x18f   :  { %vm618_vm5 = vcmask 1044480   ;;  %v505_v35 = vadd.f32 %v504_v42, %v503_v27  ;;  %v546_v6 = vadd.f32 %v545_v40, %v544_v54  ;;  %v577_v8 = vadd.f32 %v576_v0, %v575_v57 }
 0x190   :  { %v749_v10 = vsel %vm588_vm2, 1.0, %v836_v49  ;;  %vm620_vm6 = vcmask 1045504   ;;  %v530_v38 = vrot.slane %v529_v1, 1  ;;  %v554_v11 = vrot.slane %v553_v2, 2 }
 0x191   :  { %v570_v12 = vadd.f32 %v569_v53, %v568_v62  ;;  %v750_v13 = vsel %vm589_vm4, 1.0, %v836_v49  ;;  %vm622_vm7 = vcmask 1046528   ;;  %v547_v16 = vrot.slane %v546_v6, 1 }
 0x192   :  { %v578_v17 = vrot.slane %v577_v8, 4  ;;  %v594_v19 = vadd.f32 %v750_v13, %v749_v10  ;;  %v601_v20 = vmul.f32 %v749_v10, %v970_v36  ;;  %v522_v21 = vadd.f32 %v521_v63, %v520_v52 }
 0x193   :  { %v555_v44 = vadd.f32 %v554_v11, %v553_v2  ;;  %v571_v25 = vrot.slane %v570_v12, 2  ;;  %v602_v26 = vmul.f32 %v959_v32, %v750_v13  ;;  %v531_v27 = vadd.f32 %v530_v38, %v529_v1 }
 0x194   :  { %v579_v28 = vadd.f32 %v578_v17, %v577_v8  ;;  %v595_v29 = vrot.slane %v594_v19, 4  ;;  %v611_v30 = vsel %vm610_vm15, %v1026_v50, %v1035_v59  ;;  %v548_v41 = vadd.f32 %v547_v16, %v546_v6 }
 0x195   :  { %v572_v49 = vadd.f32 %v571_v25, %v570_v12  ;;  %v603_v42 = vadd.f32 %v602_v26, %v601_v20  ;;  %v613_v45 = vsel %vm612_vm0, %v611_v30, %v1052_v7  ;;  %v624_v54 = vsel %vm610_vm15, %v1126_v43, %v1138_v4 }
 0x196   :  { %v580_v37 = vrot.slane %v579_v28, 2  ;;  %v596_v51 = vadd.f32 %v595_v29, %v594_v19  ;;  %v615_v52 = vsel %vm614_vm1, %v613_v45, %v1060_v15  ;;  %v556_v55 = vrot.slane %v555_v44, 1 }
 0x197   :  { %v573_v57 = vrot.slane %v572_v49, 1  ;;  %v604_v60 = vrot.slane %v603_v42, 4  ;;  %v617_v50 = vsel %vm616_vm3, %v615_v52, %v1078_v3  ;;  %v625_v62 = vsel %vm612_vm0, %v624_v54, %v1148_v47 }
 0x198   :  { %v581_v59 = vadd.f32 %v580_v37, %v579_v28  ;;  %v597_v23 = vrot.slane %v596_v51, 2  ;;  %v619_v7 = vsel %vm618_vm5, %v617_v50, %v1089_v22  ;;  %v626_v43 = vsel %vm614_vm1, %v625_v62, %v496_v34 }
 0x199   :  { %v574_v63 = vadd.f32 %v573_v57, %v572_v49  ;;  %v605_v15 = vadd.f32 %v604_v60, %v603_v42  ;;  %v621_v40 = vsel %vm620_vm6, %v619_v7, %v1095_v33  ;;  %v627_v1 = vsel %vm616_vm3, %v626_v43, %v522_v21 }
 0x19a   :  { %v582_v4 = vrot.slane %v581_v59, 1  ;;  %v598_v0 = vadd.f32 %v597_v23, %v596_v51  ;;  %v623_v3 = vsel %vm622_vm7, %v621_v40, %v1114_v46  ;;  %v628_v22 = vsel %vm618_vm5, %v627_v1, %v548_v41 }
 0x19b   :  { %v606_v2 = vrot.slane %v605_v15, 2  ;;  %v631_v47 = vsel %vm610_vm15, %v1033_v58, %v1041_v31  ;;  %v638_v33 = vsel %vm610_vm15, %v1131_v56, %v1140_v5  ;;  %v557_v53 = vadd.f32 %v556_v55, %v555_v44 }
 0x19c   :  { %v599_v34 = vrot.slane %v598_v0, 1  ;;  %v629_v6 = vsel %vm620_vm6, %v628_v22, %v574_v63  ;;  %v632_v46 = vsel %vm612_vm0, %v631_v47, %v1058_v14  ;;  %v639_v38 = vsel %vm612_vm0, %v638_v33, %v1155_v39 }
 0x19d   :  { %v607_v8 = vadd.f32 %v606_v2, %v605_v15  ;;  %v633_v10 = vsel %vm614_vm1, %v632_v46, %v1075_v61  ;;  %v645_v58 = vmul.f32 %v623_v3, %v970_v36  ;;  %v583_v31 = vadd.f32 %v582_v4, %v581_v59 }
 0x19e   :  { %v600_v11 = vadd.f32 %v599_v34, %v598_v0  ;;  %v634_v56 = vsel %vm616_vm3, %v633_v10, %v1083_v9  ;;  %v640_v5 = vsel %vm614_vm1, %v639_v38, %v505_v35  ;;  %810 = vrcp.f32 %v623_v3 }
 0x19f   :  { %v608_v12 = vrot.slane %v607_v8, 1  ;;  %v635_v14 = vsel %vm618_vm5, %v634_v56, %v1091_v24  ;;  %v641_v13 = vsel %vm616_vm3, %v640_v5, %v531_v27  ;;  %v647_v16 = vadd.f32 1.0, %v645_v58 }
 0x1a0   :  { %v630_v61 = vsel %vm622_vm7, %v629_v6, %v600_v11  ;;  %v636_v39 = vsel %vm620_vm6, %v635_v14, %v1101_v48  ;;  %v642_v17 = vsel %vm618_vm5, %v641_v13, %v557_v53 }
 0x1a1   :  { %v637_v19 = vsel %vm622_vm7, %v636_v39, %v1121_v18  ;;  %v643_v9 = vsel %vm620_vm6, %v642_v17, %v583_v31  ;;  %v646_v35 = vmul.f32 %v959_v32, %v630_v61  ;;  %v609_v20 = vadd.f32 %v608_v12, %v607_v8 }
 0x1a2   :  { %vm649_vm8 = vcmp.gt.f32.partialorder %v647_v16, %v637_v19  ;;  %812 = vrcp.f32 %v630_v61  ;;  %v751_v42 = vadd.f32 -1.0, %v637_v19 }
 0x1a3   :  { %v648_v24 = vadd.f32 1.0, %v646_v35  ;;  %v644_v21 = vsel %vm622_vm7, %v643_v9, %v609_v20  ;;  %v651_v44 = vsel %vm649_vm8, %v623_v3, 0.0 }
 0x1a4   :  { %v752_v45 = vadd.f32 -1.0, %v644_v21 }
 0x1a5   :  { %vm650_vm9 = vcmp.gt.f32.partialorder %v648_v24, %v644_v21 }
 0x1a6   :  { %v652_v48 = vsel %vm650_vm9, %v630_v61, 0.0 }
 0x1a7   :  { %v653_v25 = vmax.f32 %v651_v44, %v652_v48 }
 0x1a9   :  { %v654_v26 = vrot.slane %v653_v25, 4 }
 0x1ab   :  { %v655_v27 = vmax.f32 %v653_v25, %v654_v26  ;;  %v811_v30 = vpop.eup %810 }
 0x1ac   :  { %v668_v37 = vmul.f32 %v811_v30, %v751_v42 }
 0x1ad   :  { %v656_v18 = vrot.slane %v655_v27, 2 }
 0x1af   :  { %v657_v28 = vmax.f32 %v655_v27, %v656_v18  ;;  %v813_v41 = vpop.eup %812 }
 0x1b0   :  { %v669_v51 = vmul.f32 %v813_v41, %v752_v45 }
 0x1b1   :  { %v658_v29 = vrot.slane %v657_v28, 1 }
 0x1b3   :  { %v659_v49 = vmax.f32 %v657_v28, %v658_v29 }
 0x1b5   :  { %vm660_vm10 = vcmp.eq.f32.partialorder %v623_v3, %v659_v49  ;;  %vm661_vm11 = vcmp.eq.f32.partialorder %v630_v61, %v659_v49 }
 0x1b6   :  { %vm662_vm12 = vmand %vm649_vm8, %vm660_vm10 }
 0x1b7   :  { %vm663_vm13 = vmand %vm650_vm9, %vm661_vm11  ;;  %v670_v52 = vsel %vm662_vm12, %v668_v37, -inf }
 0x1b8   :  { %v671_v54 = vsel %vm663_vm13, %v669_v51, -inf }
 0x1b9   :  { %v672_v55 = vmax.f32 %v670_v52, %v671_v54 }
 0x1bb   :  { %v673_v57 = vrot.slane %v672_v55, 4 }
 0x1bd   :  { %v674_v60 = vmax.f32 %v672_v55, %v673_v57 }
 0x1bf   :  { %v675_v50 = vrot.slane %v674_v60, 2 }
 0x1c1   :  { %v676_v59 = vmax.f32 %v674_v60, %v675_v50 }
 0x1c3   :  { %v677_v23 = vrot.slane %v676_v59, 1 }
 0x1c5   :  { %v678_v7 = vmax.f32 %v676_v59, %v677_v23 }
 0x1c7   :  { %v679_v62 = vsub.f32 %v970_v36, %v678_v7  ;;  %v680_v63 = vsub.f32 %v959_v32, %v678_v7 }
 0x1c9   :  { %v681_v15 = vmax.f32 %v679_v62, 0.0  ;;  %v682_v40 = vmax.f32 %v680_v63, 0.0 }
 0x1cb   :  { %683 = vst [vmem:[#allocation2] sm:$0xff] %v681_v15  ;;  %684 = vst [vmem:[#allocation2 + $0x8] sm:$0xff] %v682_v40 }
 0x1cc   :  { %825 = shalt.err (!%p822_p4)
}
 0x1cd   :  { %s838_s22 = smov 128   ;;  %s839_s23 = smov 8  }
 0x1ce   :  { %696 = dma.vmem_to_hbm [thread:$0]  %s691_s20, 256, %s1234_s2, [#allocation3], %s838_s22, %s838_s22, %s839_s23  }
 0x1cf   :  { %834 = dma.done.wait [#allocation3], 256  }
 0x1d0   :  { %835 = vsyncadd [#allocation3], 4294967040 }
 0x1d1   :  { %700 = vsyncpa [#allocation3], 1 }

</bundles_post_ra>
